<compile_context>
chip_gen: v7x
topology: tpu7x:2x2x1
jax: 0.10.0
libtpu: 0.0.40
codegen_flags: <defaults>
</compile_context>

<pallas_src>
import functools

import jax
import jax.numpy as jnp
import numpy as np
from jax.experimental import pallas as pl
from jax.experimental.pallas import tpu as pltpu

_EPS = 1e-6


def _rra_fused_kernel(q_ref, k_ref, v_ref, s_ref, z_ref,
                      wq_ref, bq_ref, wk_ref, bk_ref, wv_ref, bv_ref,
                      wo_ref, bo_ref, r_ref, t_ref, p_ref, d_ref,
                      out_ref, s_out_ref, z_out_ref):
    f32 = jnp.float32

    # ---- fused projections: one wide MXU matmul per Q/K/V over all heads ----
    q_p = jnp.dot(q_ref[...], wq_ref[...], preferred_element_type=f32) + bq_ref[...]  # (N, H*E)
    k_p = jnp.dot(k_ref[...], wk_ref[...], preferred_element_type=f32) + bk_ref[...]  # (N, H*E)
    v_p = jnp.dot(v_ref[...], wv_ref[...], preferred_element_type=f32) + bv_ref[...]  # (N, H*M)

    # phi(x) = elu(x) + 1, inf-safe: exp only ever sees non-positive inputs.
    def _phi(x):
        return jnp.where(x > 0, x + 1.0, jnp.exp(jnp.minimum(x, 0.0)))

    pq = _phi(q_p)                                                  # (N, H*E)
    pk = _phi(k_p)                                                  # (N, H*E)

    # ---- recurrent state update, fully lane-dense (last dim = H*E*M) ----
    # R expands (., H*E) -> (., H*E*M): repeat each e-entry M times within its head.
    # T expands (., H*M) -> (., H*E*M): tile each m-entry E times within its head.
    pk_x = jnp.dot(pk, r_ref[...], preferred_element_type=f32)      # (N, H*E*M)
    v_x = jnp.dot(v_p, t_ref[...], preferred_element_type=f32)      # (N, H*E*M)
    s_new = s_ref[...] + pk_x * v_x                                 # (N, H*E*M)
    z_new = z_ref[...] + pk                                         # (N, H*E)
    s_out_ref[...] = s_new
    z_out_ref[...] = z_new

    # ---- attention readout ----
    # P contracts e: (., H*E*M) -> (., H*M).
    # D contracts e and broadcasts the per-head denominator over m: (., H*E) -> (., H*M).
    pq_x = jnp.dot(pq, r_ref[...], preferred_element_type=f32)              # (N, H*E*M)
    num = jnp.dot(pq_x * s_new, p_ref[...], preferred_element_type=f32)     # (N, H*M)
    den = jnp.dot(pq * z_new, d_ref[...], preferred_element_type=f32) + _EPS
    head_out = num / den                                                    # (N, H*M)

    # ---- fused output projection over all heads ----
    out_ref[...] = (jnp.dot(head_out, wo_ref[...], preferred_element_type=f32)
                    + bo_ref[...])


@functools.lru_cache(maxsize=None)
def _head_selectors(H, E, M):
    """Constant 0/1 matrices encoding the per-head block structure (built once)."""
    f32 = np.float32
    I_H, I_M = np.eye(H, dtype=f32), np.eye(M, dtype=f32)
    R = np.kron(np.eye(H * E, dtype=f32), np.ones((1, M), f32))    # (H*E,   H*E*M)
    T = np.kron(I_H, np.kron(np.ones((1, E), f32), I_M))           # (H*M,   H*E*M)
    P = np.kron(I_H, np.kron(np.ones((E, 1), f32), I_M))           # (H*E*M, H*M)
    D = np.kron(I_H, np.ones((E, M), f32))                         # (H*E,   H*M)
    return jnp.asarray(R), jnp.asarray(T), jnp.asarray(P), jnp.asarray(D)


def relative_recurrent_attention(query, key, value, rotary, params, n_heads, state=None):
    """Fused single-step forward. Returns (out, (S_new, Z_new)).

    params hold the fused (all-heads) Linear weights, already transposed for x @ W:
      wq (D, H*E)  bq (1, H*E)   wk (Dk, H*E)  bk (1, H*E)
      wv (Dk, H*M) bv (1, H*M)   wo (H*M, D)   bo (1, D)
    state = (S, Z) with S (N, H, E, M) and Z (N, H, E), or None for zeros.
    """
    del rotary  # TODO(synk): `rotary` is accepted but unused, matching the provided forward().

    N = query.shape[0]
    H = n_heads
    HE = params["wq"].shape[1]
    HM = params["wv"].shape[1]
    E, M = HE // H, HM // H
    HEM = H * E * M
    D_out = params["wo"].shape[1]

    if state is None:
        s0 = jnp.zeros((N, HEM), jnp.float32)
        z0 = jnp.zeros((N, HE), jnp.float32)
    else:
        S0, Z0 = state
        s0 = S0.reshape(N, HEM)   # contiguous flatten -> free, done outside the kernel
        z0 = Z0.reshape(N, HE)

    R, T, P, D = _head_selectors(H, E, M)

    vmem = pl.BlockSpec(memory_space=pltpu.MemorySpace.VMEM)
    out, s1, z1 = pl.pallas_call(
        _rra_fused_kernel,
        out_shape=(
            jax.ShapeDtypeStruct((N, D_out), jnp.float32),
            jax.ShapeDtypeStruct((N, HEM), jnp.float32),
            jax.ShapeDtypeStruct((N, HE), jnp.float32),
        ),
        in_specs=[vmem] * 17,
        out_specs=(vmem, vmem, vmem),
    )(query, key, value, s0, z0,
      params["wq"], params["bq"], params["wk"], params["bk"],
      params["wv"], params["bv"], params["wo"], params["bo"],
      R, T, P, D)

    return out, (s1.reshape(N, H, E, M), z1.reshape(N, H, E))


def _reference(q, k, v, S0, Z0, p, n_heads):
    """Pure-JAX reference of the same forward (module semantics)."""
    N = q.shape[0]
    H = n_heads
    E = p["wq"].shape[1] // H
    M = p["wv"].shape[1] // H
    phi = lambda x: jnp.where(x > 0, x + 1.0, jnp.exp(jnp.minimum(x, 0.0)))
    Q = (q @ p["wq"] + p["bq"]).reshape(N, H, E)
    K = (k @ p["wk"] + p["bk"]).reshape(N, H, E)
    V = (v @ p["wv"] + p["bv"]).reshape(N, H, M)
    pq, pk = phi(Q), phi(K)
    S1 = S0 + jnp.einsum("nhe,nhm->nhem", pk, V)
    Z1 = Z0 + pk
    num = jnp.einsum("nhe,nhem->nhm", pq, S1)
    den = jnp.einsum("nhe,nhe->nh", pq, Z1) + _EPS
    head_out = (num / den[..., None]).reshape(N, H * M)
    out = head_out @ p["wo"] + p["bo"]
    return out, S1, Z1


if __name__ == "__main__":
    # Small shapes consistent with the module: N=2, d_model=32, n_heads=4 -> E=M=8
    N, D_MODEL, D_MODEL_KEYS, H = 2, 32, 32, 4
    E = D_MODEL // H
    M = D_MODEL // H

    key = jax.random.PRNGKey(0)
    ks = jax.random.split(key, 16)

    params = {
        "wq": jax.random.normal(ks[0], (D_MODEL, H * E), jnp.float32) * 0.1,
        "bq": jax.random.normal(ks[1], (1, H * E), jnp.float32) * 0.1,
        "wk": jax.random.normal(ks[2], (D_MODEL_KEYS, H * E), jnp.float32) * 0.1,
        "bk": jax.random.normal(ks[3], (1, H * E), jnp.float32) * 0.1,
        "wv": jax.random.normal(ks[4], (D_MODEL_KEYS, H * M), jnp.float32) * 0.1,
        "bv": jax.random.normal(ks[5], (1, H * M), jnp.float32) * 0.1,
        "wo": jax.random.normal(ks[6], (H * M, D_MODEL), jnp.float32) * 0.1,
        "bo": jax.random.normal(ks[7], (1, D_MODEL), jnp.float32) * 0.1,
    }

    q = jax.random.normal(ks[10], (N, D_MODEL), jnp.float32)
    k = jax.random.normal(ks[11], (N, D_MODEL_KEYS), jnp.float32)
    v = jax.random.normal(ks[12], (N, D_MODEL_KEYS), jnp.float32)
    # Non-trivial previous recurrent state (one step in the past).
    S0 = jnp.abs(jax.random.normal(ks[13], (N, H, E, M), jnp.float32)) * 0.1
    Z0 = jnp.abs(jax.random.normal(ks[14], (N, H, E), jnp.float32)) * 0.1

    out, (S1, Z1) = relative_recurrent_attention(q, k, v, rotary=None,
                                                 params=params, n_heads=H,
                                                 state=(S0, Z0))
    jax.block_until_ready((out, S1, Z1))

    ref_out, ref_S, ref_Z = _reference(q, k, v, S0, Z0, params, H)
    ok = (bool(jnp.allclose(out, ref_out, rtol=1e-4, atol=1e-4)) and
          bool(jnp.allclose(S1, ref_S, rtol=1e-4, atol=1e-4)) and
          bool(jnp.allclose(Z1, ref_Z, rtol=1e-4, atol=1e-4)))
    if not ok:
        raise AssertionError("Pallas kernel does not match reference")
    print("KERNEL_OK")
</pallas_src>

<mosaic_0001>
module attributes {stable_mosaic.version = 11 : i64} {
  func.func @_rra_fused_kernel(%arg0: memref<2x32xf32, #tpu.memory_space<vmem>>, %arg1: memref<2x32xf32, #tpu.memory_space<vmem>>, %arg2: memref<2x32xf32, #tpu.memory_space<vmem>>, %arg3: memref<2x256xf32, #tpu.memory_space<vmem>>, %arg4: memref<2x32xf32, #tpu.memory_space<vmem>>, %arg5: memref<32x32xf32, #tpu.memory_space<vmem>>, %arg6: memref<1x32xf32, #tpu.memory_space<vmem>>, %arg7: memref<32x32xf32, #tpu.memory_space<vmem>>, %arg8: memref<1x32xf32, #tpu.memory_space<vmem>>, %arg9: memref<32x32xf32, #tpu.memory_space<vmem>>, %arg10: memref<1x32xf32, #tpu.memory_space<vmem>>, %arg11: memref<32x32xf32, #tpu.memory_space<vmem>>, %arg12: memref<1x32xf32, #tpu.memory_space<vmem>>, %arg13: memref<32x256xf32, #tpu.memory_space<vmem>>, %arg14: memref<32x256xf32, #tpu.memory_space<vmem>>, %arg15: memref<256x32xf32, #tpu.memory_space<vmem>>, %arg16: memref<32x32xf32, #tpu.memory_space<vmem>>, %arg17: memref<2x32xf32, #tpu.memory_space<vmem>>, %arg18: memref<2x256xf32, #tpu.memory_space<vmem>>, %arg19: memref<2x32xf32, #tpu.memory_space<vmem>>) attributes {dimension_semantics = [], scalar_prefetch = 0 : i64, scratch_operands = 0 : i64, tpu.core_type = #tpu.core_type<tc>} {
    %c0 = arith.constant 0 : index
    %c0_0 = arith.constant 0 : index
    %0 = vector.load %arg0[%c0, %c0_0] : memref<2x32xf32, #tpu.memory_space<vmem>>, vector<2x32xf32>
    %c0_1 = arith.constant 0 : index
    %c0_2 = arith.constant 0 : index
    %1 = vector.load %arg5[%c0_1, %c0_2] : memref<32x32xf32, #tpu.memory_space<vmem>>, vector<32x32xf32>
    %cst = arith.constant dense<0.000000e+00> : vector<2x32xf32>
    %2 = tpu.matmul %0, %1, %cst {dimension_numbers = #tpu.dot_dimension_numbers<[1], [0], [0], [1], [0, 0, 1, 1], [], []>} : vector<2x32xf32>, vector<32x32xf32>, vector<2x32xf32> -> vector<2x32xf32>
    %c0_3 = arith.constant 0 : index
    %c0_4 = arith.constant 0 : index
    %3 = vector.load %arg6[%c0_3, %c0_4] : memref<1x32xf32, #tpu.memory_space<vmem>>, vector<1x32xf32>
    %4 = vector.broadcast %3 : vector<1x32xf32> to vector<2x32xf32>
    %5 = arith.addf %2, %4 : vector<2x32xf32>
    %c0_5 = arith.constant 0 : index
    %c0_6 = arith.constant 0 : index
    %6 = vector.load %arg1[%c0_5, %c0_6] : memref<2x32xf32, #tpu.memory_space<vmem>>, vector<2x32xf32>
    %c0_7 = arith.constant 0 : index
    %c0_8 = arith.constant 0 : index
    %7 = vector.load %arg7[%c0_7, %c0_8] : memref<32x32xf32, #tpu.memory_space<vmem>>, vector<32x32xf32>
    %cst_9 = arith.constant dense<0.000000e+00> : vector<2x32xf32>
    %8 = tpu.matmul %6, %7, %cst_9 {dimension_numbers = #tpu.dot_dimension_numbers<[1], [0], [0], [1], [0, 0, 1, 1], [], []>} : vector<2x32xf32>, vector<32x32xf32>, vector<2x32xf32> -> vector<2x32xf32>
    %c0_10 = arith.constant 0 : index
    %c0_11 = arith.constant 0 : index
    %9 = vector.load %arg8[%c0_10, %c0_11] : memref<1x32xf32, #tpu.memory_space<vmem>>, vector<1x32xf32>
    %10 = vector.broadcast %9 : vector<1x32xf32> to vector<2x32xf32>
    %11 = arith.addf %8, %10 : vector<2x32xf32>
    %c0_12 = arith.constant 0 : index
    %c0_13 = arith.constant 0 : index
    %12 = vector.load %arg2[%c0_12, %c0_13] : memref<2x32xf32, #tpu.memory_space<vmem>>, vector<2x32xf32>
    %c0_14 = arith.constant 0 : index
    %c0_15 = arith.constant 0 : index
    %13 = vector.load %arg9[%c0_14, %c0_15] : memref<32x32xf32, #tpu.memory_space<vmem>>, vector<32x32xf32>
    %cst_16 = arith.constant dense<0.000000e+00> : vector<2x32xf32>
    %14 = tpu.matmul %12, %13, %cst_16 {dimension_numbers = #tpu.dot_dimension_numbers<[1], [0], [0], [1], [0, 0, 1, 1], [], []>} : vector<2x32xf32>, vector<32x32xf32>, vector<2x32xf32> -> vector<2x32xf32>
    %c0_17 = arith.constant 0 : index
    %c0_18 = arith.constant 0 : index
    %15 = vector.load %arg10[%c0_17, %c0_18] : memref<1x32xf32, #tpu.memory_space<vmem>>, vector<1x32xf32>
    %16 = vector.broadcast %15 : vector<1x32xf32> to vector<2x32xf32>
    %17 = arith.addf %14, %16 : vector<2x32xf32>
    %cst_19 = arith.constant 0.000000e+00 : f32
    %18 = vector.broadcast %cst_19 : f32 to vector<2x32xf32>
    %19 = arith.cmpf ogt, %5, %18 : vector<2x32xf32>
    %cst_20 = arith.constant 1.000000e+00 : f32
    %20 = vector.broadcast %cst_20 : f32 to vector<2x32xf32>
    %21 = arith.addf %5, %20 : vector<2x32xf32>
    %cst_21 = arith.constant 0.000000e+00 : f32
    %22 = vector.broadcast %cst_21 : f32 to vector<2x32xf32>
    %23 = arith.minimumf %5, %22 : vector<2x32xf32>
    %24 = math.exp %23 : vector<2x32xf32>
    %25 = arith.select %19, %21, %24 : vector<2x32xi1>, vector<2x32xf32>
    %cst_22 = arith.constant 0.000000e+00 : f32
    %26 = vector.broadcast %cst_22 : f32 to vector<2x32xf32>
    %27 = arith.cmpf ogt, %11, %26 : vector<2x32xf32>
    %cst_23 = arith.constant 1.000000e+00 : f32
    %28 = vector.broadcast %cst_23 : f32 to vector<2x32xf32>
    %29 = arith.addf %11, %28 : vector<2x32xf32>
    %cst_24 = arith.constant 0.000000e+00 : f32
    %30 = vector.broadcast %cst_24 : f32 to vector<2x32xf32>
    %31 = arith.minimumf %11, %30 : vector<2x32xf32>
    %32 = math.exp %31 : vector<2x32xf32>
    %33 = arith.select %27, %29, %32 : vector<2x32xi1>, vector<2x32xf32>
    %c0_25 = arith.constant 0 : index
    %c0_26 = arith.constant 0 : index
    %34 = vector.load %arg13[%c0_25, %c0_26] : memref<32x256xf32, #tpu.memory_space<vmem>>, vector<32x256xf32>
    %cst_27 = arith.constant dense<0.000000e+00> : vector<2x256xf32>
    %35 = tpu.matmul %33, %34, %cst_27 {dimension_numbers = #tpu.dot_dimension_numbers<[1], [0], [0], [1], [0, 0, 1, 1], [], []>} : vector<2x32xf32>, vector<32x256xf32>, vector<2x256xf32> -> vector<2x256xf32>
    %c0_28 = arith.constant 0 : index
    %c0_29 = arith.constant 0 : index
    %36 = vector.load %arg14[%c0_28, %c0_29] : memref<32x256xf32, #tpu.memory_space<vmem>>, vector<32x256xf32>
    %cst_30 = arith.constant dense<0.000000e+00> : vector<2x256xf32>
    %37 = tpu.matmul %17, %36, %cst_30 {dimension_numbers = #tpu.dot_dimension_numbers<[1], [0], [0], [1], [0, 0, 1, 1], [], []>} : vector<2x32xf32>, vector<32x256xf32>, vector<2x256xf32> -> vector<2x256xf32>
    %c0_31 = arith.constant 0 : index
    %c0_32 = arith.constant 0 : index
    %38 = vector.load %arg3[%c0_31, %c0_32] : memref<2x256xf32, #tpu.memory_space<vmem>>, vector<2x256xf32>
    %39 = arith.mulf %35, %37 : vector<2x256xf32>
    %40 = arith.addf %38, %39 : vector<2x256xf32>
    %c0_33 = arith.constant 0 : index
    %c0_34 = arith.constant 0 : index
    %41 = vector.load %arg4[%c0_33, %c0_34] : memref<2x32xf32, #tpu.memory_space<vmem>>, vector<2x32xf32>
    %42 = arith.addf %41, %33 : vector<2x32xf32>
    %c0_35 = arith.constant 0 : index
    %c0_36 = arith.constant 0 : index
    %43 = vector.load %arg18[%c0_35, %c0_36] : memref<2x256xf32, #tpu.memory_space<vmem>>, vector<2x256xf32>
    tpu.vector_store %arg18[%c0_35, %c0_36], %40 {strides = array<i32>} : memref<2x256xf32, #tpu.memory_space<vmem>>, vector<2x256xf32>,
    %c0_37 = arith.constant 0 : index
    %c0_38 = arith.constant 0 : index
    %44 = vector.load %arg19[%c0_37, %c0_38] : memref<2x32xf32, #tpu.memory_space<vmem>>, vector<2x32xf32>
    tpu.vector_store %arg19[%c0_37, %c0_38], %42 {strides = array<i32>} : memref<2x32xf32, #tpu.memory_space<vmem>>, vector<2x32xf32>,
    %c0_39 = arith.constant 0 : index
    %c0_40 = arith.constant 0 : index
    %45 = vector.load %arg13[%c0_39, %c0_40] : memref<32x256xf32, #tpu.memory_space<vmem>>, vector<32x256xf32>
    %cst_41 = arith.constant dense<0.000000e+00> : vector<2x256xf32>
    %46 = tpu.matmul %25, %45, %cst_41 {dimension_numbers = #tpu.dot_dimension_numbers<[1], [0], [0], [1], [0, 0, 1, 1], [], []>} : vector<2x32xf32>, vector<32x256xf32>, vector<2x256xf32> -> vector<2x256xf32>
    %47 = arith.mulf %46, %40 : vector<2x256xf32>
    %c0_42 = arith.constant 0 : index
    %c0_43 = arith.constant 0 : index
    %48 = vector.load %arg15[%c0_42, %c0_43] : memref<256x32xf32, #tpu.memory_space<vmem>>, vector<256x32xf32>
    %cst_44 = arith.constant dense<0.000000e+00> : vector<2x32xf32>
    %49 = tpu.matmul %47, %48, %cst_44 {dimension_numbers = #tpu.dot_dimension_numbers<[1], [0], [0], [1], [0, 0, 1, 1], [], []>} : vector<2x256xf32>, vector<256x32xf32>, vector<2x32xf32> -> vector<2x32xf32>
    %50 = arith.mulf %25, %42 : vector<2x32xf32>
    %c0_45 = arith.constant 0 : index
    %c0_46 = arith.constant 0 : index
    %51 = vector.load %arg16[%c0_45, %c0_46] : memref<32x32xf32, #tpu.memory_space<vmem>>, vector<32x32xf32>
    %cst_47 = arith.constant dense<0.000000e+00> : vector<2x32xf32>
    %52 = tpu.matmul %50, %51, %cst_47 {dimension_numbers = #tpu.dot_dimension_numbers<[1], [0], [0], [1], [0, 0, 1, 1], [], []>} : vector<2x32xf32>, vector<32x32xf32>, vector<2x32xf32> -> vector<2x32xf32>
    %cst_48 = arith.constant 9.99999997E-7 : f32
    %53 = vector.broadcast %cst_48 : f32 to vector<2x32xf32>
    %54 = arith.addf %52, %53 : vector<2x32xf32>
    %55 = arith.divf %49, %54 : vector<2x32xf32>
    %c0_49 = arith.constant 0 : index
    %c0_50 = arith.constant 0 : index
    %56 = vector.load %arg11[%c0_49, %c0_50] : memref<32x32xf32, #tpu.memory_space<vmem>>, vector<32x32xf32>
    %cst_51 = arith.constant dense<0.000000e+00> : vector<2x32xf32>
    %57 = tpu.matmul %55, %56, %cst_51 {dimension_numbers = #tpu.dot_dimension_numbers<[1], [0], [0], [1], [0, 0, 1, 1], [], []>} : vector<2x32xf32>, vector<32x32xf32>, vector<2x32xf32> -> vector<2x32xf32>
    %c0_52 = arith.constant 0 : index
    %c0_53 = arith.constant 0 : index
    %58 = vector.load %arg12[%c0_52, %c0_53] : memref<1x32xf32, #tpu.memory_space<vmem>>, vector<1x32xf32>
    %59 = vector.broadcast %58 : vector<1x32xf32> to vector<2x32xf32>
    %60 = arith.addf %57, %59 : vector<2x32xf32>
    %c0_54 = arith.constant 0 : index
    %c0_55 = arith.constant 0 : index
    %61 = vector.load %arg17[%c0_54, %c0_55] : memref<2x32xf32, #tpu.memory_space<vmem>>, vector<2x32xf32>
    tpu.vector_store %arg17[%c0_54, %c0_55], %60 {strides = array<i32>} : memref<2x32xf32, #tpu.memory_space<vmem>>, vector<2x32xf32>,
    return
  }
}

</mosaic_0001>

<bundles_post_ra>
// kernel: tpu_custom_call.1
= control target key start
LH: loop header
LB: loop body
LE: loop exit
PB: predicated region body
PF: predicated region fallthrough
CT: control target
= control target key end

     0   :  { %s1631_s0 = inlined_call_operand.vmem [shape: f32[2,32], index: 0, kind: input, shape index: {}]   ;;  %s1632_s1 = inlined_call_operand.vmem [shape: f32[2,32], index: 1, kind: input, shape index: {}]   ;;  %s1633_s2 = inlined_call_operand.vmem [shape: f32[2,32], index: 2, kind: input, shape index: {}]   ;;  %s1634_s3 = inlined_call_operand.vmem [shape: f32[2,256], index: 3, kind: input, shape index: {}]   ;;  %s1635_s4 = inlined_call_operand.vmem [shape: f32[2,32], index: 4, kind: input, shape index: {}]   ;;  %s1636_s5 = inlined_call_operand.vmem [shape: f32[32,32], index: 5, kind: input, shape index: {}]   ;;  %s1637_s6 = inlined_call_operand.vmem [shape: f32[1,32], index: 6, kind: input, shape index: {}]   ;;  %s1638_s7 = inlined_call_operand.vmem [shape: f32[32,32], index: 7, kind: input, shape index: {}]   ;;  %s1639_s8 = inlined_call_operand.vmem [shape: f32[1,32], index: 8, kind: input, shape index: {}]   ;;  %s1640_s9 = inlined_call_operand.vmem [shape: f32[32,32], index: 9, kind: input, shape index: {}]   ;;  %s1641_s10 = inlined_call_operand.vmem [shape: f32[1,32], index: 10, kind: input, shape index: {}]   ;;  %s1642_s11 = inlined_call_operand.vmem [shape: f32[32,32], index: 11, kind: input, shape index: {}]   ;;  %s1643_s12 = inlined_call_operand.vmem [shape: f32[1,32], index: 12, kind: input, shape index: {}]   ;;  %s1644_s13 = inlined_call_operand.vmem [shape: f32[32,256], index: 13, kind: input, shape index: {}]   ;;  %s1645_s14 = inlined_call_operand.vmem [shape: f32[32,256], index: 14, kind: input, shape index: {}]   ;;  %s1646_s15 = inlined_call_operand.vmem [shape: f32[256,32], index: 15, kind: input, shape index: {}]   ;;  %s1647_s16 = inlined_call_operand.vmem [shape: f32[32,32], index: 16, kind: input, shape index: {}]   ;;  %s1648_s17 = inlined_call_operand.hbm [shape: f32[2,32], index: 17, kind: output, shape index: {0}]   ;;  %s1649_s18 = inlined_call_operand.hbm [shape: f32[2,256], index: 18, kind: output, shape index: {1}]   ;;  %s1650_s19 = inlined_call_operand.hbm [shape: f32[2,32], index: 19, kind: output, shape index: {2}]  }
   0x1   :  { %1651 = sst [smem:[#allocation9_spill]] %s1631_s0 }
   0x2   :  { %1652 = sst [smem:[#allocation10_spill]] %s1632_s1 }
   0x3   :  { %1653 = sst [smem:[#allocation11_spill]] %s1633_s2 }
   0x4   :  { %1654 = sst [smem:[#allocation12_spill]] %s1634_s3 }
   0x5   :  { %25 = vsyncpa [#allocation3], 0  ;;  %v62_v0 = vld [vmem:[%s1636_s5] sm:$0xff]  ;;  %v63_v1 = vld [vmem:[%s1636_s5 + $0x8] sm:$0xff]  ;;  %v1212_v3 = vmov 0.0|0.0   ;;  %vm1213_vm0 = vmmov 0  }
   0x6   :  { %v64_v2 = vld [vmem:[%s1636_s5 + $0x10] sm:$0xff]  ;;  %1043 = vmatprep.subr.bf16.mxu1 %v1212_v3  ;;  %v1044_v4 = vpack.c.bf16 %v63_v1, %v62_v0  ;;  %v65_v5 = vld [vmem:[%s1636_s5 + $0x18] sm:$0xff]  ;;  %v1214_v6 = vmov 0.0   ;;  %1055 = vmatprep.subr.bf16.mxu0 %v1212_v3  ;;  %v148_v8 = vld [vmem:[%s1638_s7] sm:$0xff] }
   0x7   :  { %996 = vmatprep.mubr.msk.f32.mxu1 %vm1213_vm0, %v1214_v6  ;;  %1018 = vmatprep.mubr.msk.f32.mxu0 %vm1213_vm0, %v1214_v6  ;;  %v1047_v7 = vpack.c.bf16 %v65_v5, %v64_v2  ;;  %v233_v9 = vld [vmem:[%s1640_s9] sm:$0xff]  ;;  %v234_v10 = vld [vmem:[%s1640_s9 + $0x8] sm:$0xff]  ;;  %v235_v13 = vld [vmem:[%s1640_s9 + $0x10] sm:$0xff] }
   0x8   :  { %1045 = vmatpush3.bf16.msra.mxu1 %v1044_v4  ;;  %v149_v11 = vld [vmem:[%s1638_s7 + $0x8] sm:$0xff]  ;;  %v1056_v12 = vpack.c.bf16 %v234_v10, %v233_v9  ;;  %v236_v14 = vld [vmem:[%s1640_s9 + $0x18] sm:$0xff] }
   0x9   :  { %1046 = vmatprep.subr.bf16.mxu1 %v1212_v3 }
   0xa   :  { %26 = vsyncpa [#allocation5], 0  ;;  %1057 = vmatpush3.bf16.msra.mxu0 %v1056_v12  ;;  %v1059_v15 = vpack.c.bf16 %v236_v14, %v235_v13  ;;  %s1655_s2 = sld [smem:[#allocation9_spill]]  ;;  %vm73_vm1 = vcmask 261120   ;;  %v1050_v17 = vpack.c.bf16 %v149_v11, %v148_v8  ;;  %v150_v18 = vld [vmem:[%s1638_s7 + $0x10] sm:$0xff]  ;;  %v151_v19 = vld [vmem:[%s1638_s7 + $0x18] sm:$0xff] }
   0xb   :  { %1058 = vmatprep.subr.bf16.mxu0 %v1212_v3  ;;  %s1656_s5 = sld [smem:[#allocation11_spill]]  ;;  %v1053_v21 = vpack.c.bf16 %v151_v19, %v150_v18  ;;  %s1657_s28 = sld [smem:[#allocation10_spill]]  ;;  %v330_v23 = vld [vmem:[%s1644_s13 + $0x8] sm:$0xff]  ;;  %v332_v24 = vld [vmem:[%s1644_s13 + $0x18] sm:$0xff]  ;;  %v329_v28 = vld [vmem:[%s1644_s13] sm:$0xff]  ;;  %vm511_vm3 = vcmask 254976  }
   0xc   :  { %1048 = vmatpush3.bf16.msra.mxu1 %v1047_v7  ;;  %v412_v25 = vld [vmem:[%s1645_s14 + $0x8] sm:$0xff]  ;;  %v1061_v26 = vpack.c.bf16 %v332_v24, %v330_v23  ;;  %v414_v27 = vld [vmem:[%s1645_s14 + $0x18] sm:$0xff]  ;;  %v331_v29 = vld [vmem:[%s1644_s13 + $0x10] sm:$0xff]  ;;  %s1658_s22 = sld [smem:[#allocation12_spill]]  ;;  %s1216_s25 = smov [#allocation4]  }
   0xd   :  { %1049 = vmatprep.subr.bf16.mxu1 %v1212_v3  ;;  %v1069_v30 = vpack.c.bf16 %v414_v27, %v412_v25  ;;  %v1399_v31 = vpack.c.bf16 %v331_v29, %v329_v28  ;;  %v411_v32 = vld [vmem:[%s1645_s14] sm:$0xff]  ;;  %v413_v33 = vld [vmem:[%s1645_s14 + $0x10] sm:$0xff]  ;;  %v334_v34 = vld [vmem:[%s1644_s13 + $0x28] sm:$0xff]  ;;  %s891_s9 = sshll.u32 %s1216_s25, 4  ;;  %s892_s9 = int_to_ptr.vmem [resolvable:$true] %s891_s9 }
   0xe   :  { %1060 = vmatpush3.bf16.msra.mxu0 %v1059_v15  ;;  %v1071_v35 = vpack.c.bf16 %v413_v33, %v411_v32  ;;  %v336_v36 = vld [vmem:[%s1644_s13 + $0x38] sm:$0xff]  ;;  %v416_v37 = vld [vmem:[%s1645_s14 + $0x28] sm:$0xff]  ;;  %v333_v41 = vld [vmem:[%s1644_s13 + $0x20] sm:$0xff]  ;;  %p1147_p1 = scmp.lt.s32.totalorder %s892_s9, %s892_s9 }
   0xf   :  { %v418_v38 = vld [vmem:[%s1645_s14 + $0x38] sm:$0xff]  ;;  %1070 = vmatprep.subr.bf16.mxu0 %v1069_v30  ;;  %v1420_v39 = vpack.c.bf16 %v336_v36, %v334_v34  ;;  %v335_v42 = vld [vmem:[%s1644_s13 + $0x30] sm:$0xff]  ;;  %v415_v44 = vld [vmem:[%s1645_s14 + $0x20] sm:$0xff] }
  0x10   :  { %v61_v16 = vld [vmem:[%s1655_s2] sm:$0x3]  ;;  %v1073_v40 = vpack.c.bf16 %v418_v38, %v416_v37  ;;  %v1428_v43 = vpack.c.bf16 %v335_v42, %v333_v41  ;;  %v417_v45 = vld [vmem:[%s1645_s14 + $0x30] sm:$0xff]  ;;  %v625_v48 = vld [vmem:[%s1646_s15 + $0x88] sm:$0xff] }
  0x11   :  { %997 = vmatmul.mubr.msk.f32.vlgmr.msra.gmra.mrb[0].mxu1 %vm73_vm1, %v61_v16  ;;  %v232_v20 = vld [vmem:[%s1656_s5] sm:$0x3]  ;;  %v1075_v46 = vpack.c.bf16 %v417_v45, %v415_v44  ;;  %v609_v53 = vld [vmem:[%s1646_s15 + $0x8] sm:$0xff]  ;;  %v626_v56 = vld [vmem:[%s1646_s15 + $0x90] sm:$0xff] }
  0x12   :  { %1051 = vmatpush3.bf16.msra.mxu1 %v1050_v17  ;;  %1007 = vmatprep.mubr.msk.f32.mxu1 %vm1213_vm0, %v1214_v6  ;;  %v147_v22 = vld [vmem:[%s1657_s28] sm:$0x3]  ;;  %v627_v57 = vld [vmem:[%s1646_s15 + $0x98] sm:$0xff]  ;;  %v610_v0 = vld [vmem:[%s1646_s15 + $0x10] sm:$0xff] }
  0x13   :  { %1052 = vmatprep.subr.bf16.mxu1 %v1212_v3  ;;  %1019 = vmatmul.mubr.msk.f32.vlgmr.msra.gmra.mrb[0].mxu0 %vm73_vm1, %v232_v20  ;;  %v624_v47 = vld [vmem:[%s1646_s15 + $0x80] sm:$0xff]  ;;  %v1089_v63 = vpack.c.bf16 %v627_v57, %v626_v56  ;;  %v611_v1 = vld [vmem:[%s1646_s15 + $0x18] sm:$0xff]  ;;  %v629_v4 = vld [vmem:[%s1646_s15 + $0xa8] sm:$0xff] }
  0x14   :  { %486 = vmatprep.mubr.f32.mxu0 %v1214_v6  ;;  %1072 = vmatpush1.bf16.msra.mxu0 %v1071_v35  ;;  %v1085_v49 = vpack.c.bf16 %v625_v48, %v624_v47  ;;  %v916_v50 = vld [vmem:[%s1637_s6] ss:$0 sm:$0xff]  ;;  %v1091_v8 = vpack.c.bf16 %v611_v1, %v610_v0  ;;  %v613_v12 = vld [vmem:[%s1646_s15 + $0x28] sm:$0xff]  ;;  %v630_v15 = vld [vmem:[%s1646_s15 + $0xb0] sm:$0xff] }
  0x15   :  { %1074 = vmatprep.subr.bf16.mxu0 %v1073_v40  ;;  %v608_v52 = vld [vmem:[%s1646_s15] sm:$0xff]  ;;  %v631_v16 = vld [vmem:[%s1646_s15 + $0xb8] sm:$0xff]  ;;  %v712_v36 = vld [vmem:[%s1647_s16 + $0x8] sm:$0xff] }
  0x16   :  { %1054 = vmatpush3.bf16.msra.mxu1 %v1053_v21  ;;  %v920_v55 = vld [vmem:[%s1641_s10] ss:$0 sm:$0xff]  ;;  %v1087_v60 = vpack.c.bf16 %v609_v53, %v608_v52  ;;  %v1097_v20 = vpack.c.bf16 %v631_v16, %v630_v15  ;;  %v614_v21 = vld [vmem:[%s1646_s15 + $0x30] sm:$0xff]  ;;  %v714_v38 = vld [vmem:[%s1647_s16 + $0x18] sm:$0xff] }
  0x17   :  { %1062 = vmatprep.subr.bf16.mxu1 %v1061_v26  ;;  %v628_v2 = vld [vmem:[%s1646_s15 + $0xa0] sm:$0xff]  ;;  %v633_v41 = vld [vmem:[%s1646_s15 + $0xc8] sm:$0xff]  ;;  %v618_v48 = vld [vmem:[%s1646_s15 + $0x50] sm:$0xff] }
  0x18   :  { %1076 = vmatpush1.bf16.msra.mxu0 %v1075_v46  ;;  %v918_v7 = vld [vmem:[%s1639_s8] ss:$0 sm:$0xff]  ;;  %v1093_v10 = vpack.c.bf16 %v629_v4, %v628_v2  ;;  %v617_v44 = vld [vmem:[%s1646_s15 + $0x48] sm:$0xff]  ;;  %v635_v46 = vld [vmem:[%s1646_s15 + $0xd8] sm:$0xff] }
  0x19   :  { %1008 = vmatmul.mubr.msk.f32.vlgmr.msra.gmra.mrb[2].mxu1 %vm73_vm1, %v147_v22  ;;  %1086 = vmatprep.subr.bf16.mxu0 %v1085_v49  ;;  %v612_v11 = vld [vmem:[%s1646_s15 + $0x20] sm:$0xff]  ;;  %v615_v22 = vld [vmem:[%s1646_s15 + $0x38] sm:$0xff]  ;;  %v637_v52 = vld [vmem:[%s1646_s15 + $0xe8] sm:$0xff] }
  0x1a   :  { %404 = vmatprep.mubr.f32.mxu1 %v1214_v6  ;;  %1064 = vmatpush1.bf16.msra.mxu1 %v1399_v31  ;;  %v1095_v19 = vpack.c.bf16 %v613_v12, %v612_v11  ;;  %v1099_v24 = vpack.c.bf16 %v615_v22, %v614_v21  ;;  %v508_v27 = vld [vmem:[%s1635_s4] sm:$0x3]  ;;  %v619_v49 = vld [vmem:[%s1646_s15 + $0x58] sm:$0xff]  ;;  %v638_v57 = vld [vmem:[%s1646_s15 + $0xf0] sm:$0xff]  ;;  %s1142_s4 = scalar_lea.vmem %s892_s9, 64 }
  0x1b   :  { %1066 = vmatprep.subr.bf16.mxu1 %v1420_v39  ;;  %v711_v35 = vld [vmem:[%s1647_s16] sm:$0xff]  ;;  %v791_v0 = vld [vmem:[%s1642_s11 + $0x8] sm:$0xff]  ;;  %p1143_p0 = scmp.ne.s32.totalorder %s892_s9, %s1142_s4  ;;  %p1148_p2 = scmp.lt.s32.totalorder %s1142_s4, %s1142_s4 }
  0x1c   :  { %v1118_v37 = vpack.c.bf16 %v712_v36, %v711_v35  ;;  %v632_v40 = vld [vmem:[%s1646_s15 + $0xc0] sm:$0xff] }
  0x1d   :  { %v1101_v42 = vpack.c.bf16 %v633_v41, %v632_v40  ;;  %p1149_p3 = por %p1148_p2, %p1147_p1 }
  0x1e   :  { %1068 = vmatpush1.bf16.msra.mxu1 %v1428_v43 }
  0x1f   :  { %1078 = vmatprep.subr.bf16.mxu1 %v1061_v26  ;;  %p1150_p4 = pnand %p1149_p3, %p1143_p0 }
  0xe4   :  { %v143_v51 = vpop.f32.mrb[0].mxu1 }
  0xe5   :  { %v998_v54 = vpop.f32.mrb[1].mxu1  ;;  %v144_v58 = vadd.f32 %v916_v50, %v143_v51  ;;  %v1107_v50 = vpack.c.bf16 %v619_v49, %v618_v48  ;;  %v636_v51 = vld [vmem:[%s1646_s15 + $0xe0] sm:$0xff] }
  0xe6   :  { %v313_v59 = vpop.f32.mrb[0].mxu0  ;;  %v1109_v53 = vpack.c.bf16 %v637_v52, %v636_v51  ;;  %v620_v54 = vld [vmem:[%s1646_s15 + $0x60] sm:$0xff] }
  0xe7   :  { %v314_v61 = vadd.f32 %v920_v55, %v313_v59  ;;  %v1020_v62 = vpop.f32.mrb[1].mxu0  ;;  %v319_v5 = vmin.f32 %v144_v58, 0.0  ;;  %v318_v29 = vadd.f32 1.0, %v144_v58  ;;  %vm317_vm4 = vcmp.gt.f32.partialorder %v144_v58, 0.0  ;;  %v621_v55 = vld [vmem:[%s1646_s15 + $0x68] sm:$0xff]  ;;  %v639_v58 = vld [vmem:[%s1646_s15 + $0xf8] sm:$0xff] }
  0xe8   :  { %v1111_v56 = vpack.c.bf16 %v621_v55, %v620_v54  ;;  %v1113_v59 = vpack.c.bf16 %v639_v58, %v638_v57 }
  0xe9   :  { %923 = vmatmul.mubr.msk.f32.vlgmr.msra.gmra.mrb[2].mxu0 %vm73_vm1, %v314_v61  ;;  %v320_v17 = vmul.f32 1.442695, %v319_v5  ;;  %v623_v61 = vld [vmem:[%s1646_s15 + $0x78] sm:$0xff]  ;;  %v1215_v5 = vmov 1983009808  }
  0xea   :  { %1088 = vmatpush3.bf16.msra.mxu0 %v1087_v60  ;;  %v622_v60 = vld [vmem:[%s1646_s15 + $0x70] sm:$0xff] }
  0xeb   :  { %1090 = vmatprep.subr.bf16.mxu0 %v1089_v63  ;;  %1136 = vpow2.f32 %v320_v17  ;;  %v1115_v62 = vpack.c.bf16 %v623_v61, %v622_v60  ;;  %v790_v63 = vld [vmem:[%s1642_s11] sm:$0xff] }
  0xec   :  { %v228_v9 = vpop.f32.mrb[2].mxu1  ;;  %v1124_v1 = vpack.c.bf16 %v791_v0, %v790_v63  ;;  %v493_v17 = vld [vmem:[%s1658_s22] sm:$0xf] }
  0xed   :  { %v229_v13 = vadd.f32 %v918_v7, %v228_v9  ;;  %v1009_v14 = vpop.f32.mrb[3].mxu1  ;;  %v500_v7 = vunpack.c.l.s4 %v1215_v5 }
  0xee   :  { %1092 = vmatpush3.bf16.msra.mxu0 %v1091_v8  ;;  %v502_v8 = vlaneseq }
  0xef   :  { %v325_v18 = vmin.f32 %v229_v13, 0.0  ;;  %1094 = vmatprep.subr.bf16.mxu0 %v1093_v10  ;;  %v324_v26 = vadd.f32 1.0, %v229_v13  ;;  %vm323_vm2 = vcmp.gt.f32.partialorder %v229_v13, 0.0  ;;  %v501_v9 = vunpack.c.0.s8 %v500_v7 }
  0xf0   :  { %v503_v10 = vshrl.u32 %v502_v8, 7 }
  0xf1   :  { %v326_v23 = vmul.f32 1.442695, %v325_v18 }
  0xf2   :  { %1096 = vmatpush3.bf16.msra.mxu0 %v1095_v19  ;;  %v504_v15 = vsub.s32 %v501_v9, %v503_v10 }
  0xf3   :  { %1138 = vpow2.f32 %v326_v23  ;;  %1098 = vmatprep.subr.bf16.mxu0 %v1097_v20 }
  0xf5   :  { %v1137_v25 = vpop.eup %1136 }
  0xf6   :  { %1100 = vmatpush3.bf16.msra.mxu0 %v1099_v24  ;;  %v322_v33 = vsel %vm317_vm4, %v318_v29, %v1137_v25 }
  0xf7   :  { %1102 = vmatprep.subr.bf16.mxu0 %v1101_v42 }
  0xfd   :  { %v1139_v28 = vpop.eup %1138 }
  0xfe   :  { %v328_v30 = vsel %vm323_vm2, %v324_v26, %v1139_v28  ;;  %v793_v28 = vld [vmem:[%s1642_s11 + $0x18] sm:$0xff] }
  0xff   :  { %922 = vmatmul.mubr.msk.f32.vlgmr.msra.gmra.mrb[4].mxu1 %vm73_vm1, %v328_v30  ;;  %v509_v32 = vadd.f32 %v508_v27, %v328_v30  ;;  %v792_v27 = vld [vmem:[%s1642_s11 + $0x10] sm:$0xff] }
 0x100   :  { %1080 = vmatpush1.bf16.msra.mxu1 %v1399_v31  ;;  %588 = vmatprep.mubr.f32.mxu1 %v1214_v6  ;;  %v713_v31 = vld [vmem:[%s1647_s16 + $0x10] sm:$0xff]  ;;  %v1127_v29 = vpack.c.bf16 %v793_v28, %v792_v27 }
 0x101   :  { %1082 = vmatprep.subr.bf16.mxu1 %v1420_v39  ;;  %v710_v34 = vmul.f32 %v509_v32, %v322_v33  ;;  %512 = vst.msk [vmem:[#allocation6] sm:$0x3] %vm511_vm3, %v509_v32  ;;  %v1121_v39 = vpack.c.bf16 %v714_v38, %v713_v31 }
 0x104   :  { %1084 = vmatpush1.bf16.msra.mxu1 %v1428_v43  ;;  %v616_v43 = vld [vmem:[%s1646_s15 + $0x40] sm:$0xff] }
 0x105   :  { %1117 = vmatprep.subr.bf16.mxu1 %v1212_v3  ;;  %v1103_v45 = vpack.c.bf16 %v617_v44, %v616_v43 }
 0x107   :  { %924 = vmatmul.mubr.msk.f32.vlgmr.msra.gmra.mrb[6].mxu1 %vm73_vm1, %v322_v33  ;;  %1104 = vmatpush3.bf16.msra.mxu0 %v1103_v45 }
 0x108   :  { %1119 = vmatpush3.bf16.msra.mxu1 %v1118_v37  ;;  %1029 = vmatprep.mubr.msk.f32.mxu1 %vm1213_vm0, %v1214_v6 }
 0x109   :  { %1120 = vmatprep.subr.bf16.mxu1 %v1212_v3 }
 0x10c   :  { %1122 = vmatpush3.bf16.msra.mxu1 %v1121_v39 }
 0x10d   :  { %1123 = vmatprep.subr.bf16.mxu1 %v1212_v3 }
 0x10f   :  { %1030 = vmatmul.mubr.msk.f32.vlgmr.msra.gmra.mrb[8].mxu1 %vm73_vm1, %v710_v34 }
 0x110   :  { %1040 = vmatprep.mubr.msk.f32.mxu1 %vm1213_vm0, %v1214_v6  ;;  %v634_v6 = vld [vmem:[%s1646_s15 + $0xd0] sm:$0xff]  ;;  %1125 = vmatpush3.bf16.msra.mxu1 %v1124_v1 }
 0x111   :  { %v1105_v47 = vpack.c.bf16 %v635_v46, %v634_v6  ;;  %1126 = vmatprep.subr.bf16.mxu1 %v1212_v3 }
 0x113   :  { %1106 = vmatprep.subr.bf16.mxu0 %v1105_v47 }
 0x114   :  { %1108 = vmatpush3.bf16.msra.mxu0 %v1107_v50  ;;  %1128 = vmatpush3.bf16.msra.mxu1 %v1127_v29 }
 0x115   :  { %1110 = vmatprep.subr.bf16.mxu0 %v1109_v53 }
 0x118   :  { %1112 = vmatpush3.bf16.msra.mxu0 %v1111_v56 }
 0x119   :  { %1114 = vmatprep.subr.bf16.mxu0 %v1113_v59 }
 0x11c   :  { %1116 = vmatpush3.bf16.msra.mxu0 %v1115_v62 }
 0x1bc   :  { %v488_v2 = vpop.f32.mrb[2].mxu0 }
 0x1bd   :  { %v490_v4 = vpop.f32.mrb[3].mxu0 }
 0x1d2   :  { %v406_v11 = vpop.f32.mrb[4].mxu1 }
 0x1d3   :  { %v494_v12 = vmul.f32 %v488_v2, %v406_v11  ;;  %v408_v13 = vpop.f32.mrb[5].mxu1 }
 0x1d4   :  { %v495_v14 = vmul.f32 %v490_v4, %v408_v13 }
 0x1d6   :  { %v498_v16 = vcombine.low %v494_v12, %v495_v14 }
 0x1d8   :  { %v505_v18 = vrot.slane %v498_v16, %v504_v15 }
 0x1da   :  { %v507_v19 = vadd.f32 %v505_v18, %v493_v17  ;;  %v590_v3 = vpop.f32.mrb[6].mxu1 }
 0x1db   :  { %v592_v20 = vpop.f32.mrb[7].mxu1 }
 0x1dc   :  { %v602_v21 = vrot.slane %v507_v19, %v504_v15  ;;  %510 = vst [vmem:[#allocation4] sm:$0xf] %v507_v19 }
 0x1de   :  { %v606_v22 = vmul.f32 %v602_v21, %v590_v3  ;;  %v603_v23 = vcombine.high %v602_v21, %v602_v21 }
 0x1e0   :  { %v607_v24 = vmul.f32 %v603_v23, %v592_v20 }
 0x1e2   :  { %v784_v25 = vpop.f32.mrb[8].mxu1  ;;  %704 = vmatprep.mubr.f32.mxu0 %v607_v24 }
 0x1e3   :  { %v1031_v26 = vpop.f32.mrb[9].mxu1  ;;  %705 = vmatmul.mubr.f32.vlgmr.msra.gmra.mrb[4].mxu0 %v606_v22  ;;  %v785_v30 = vadd.f32 1e-06, %v784_v25 }
 0x1e5   :  { %1140 = vrcp.f32 %v785_v30 }
 0x1ef   :  { %v1141_v35 = vpop.eup %1140 }
 0x2b6   :  { %v975_v32 = vpop.f32.mrb[4].mxu0 }
 0x2b7   :  { %v976_v33 = vpop.f32.mrb[5].mxu0 }
 0x2b8   :  { %v977_v34 = vadd.f32 %v976_v33, %v975_v32 }
 0x2ba   :  { %v789_v36 = vmul.f32 %v1141_v35, %v977_v34 }
 0x2bc   :  { %1041 = vmatmul.mubr.msk.f32.vlgmr.msra.gmra.mrb[10].mxu1 %vm73_vm1, %v789_v36 }
 0x2bd   :  { %1153 = shalt.err (!%p1150_p4)
}
 0x2be   :  { %s1154_s3 = scalar_lea.hbm %s1649_s18, 64 }
 0x2bf   :  { %p1155_p5 = scmp.ne.s32.totalorder %s1649_s18, %s1154_s3  ;;  %p1158_p6 = scmp.lt.u32.totalorder %s1154_s3, %s1649_s18 }
 0x2c1   :  { %p1160_p7 = pnand %p1158_p6, %p1155_p5 }
 0x2c3   :  { %1163 = shalt.err (!%p1160_p7)
}
 0x2c4   :  { %894 = dma.vmem_to_hbm [thread:$0]  %s892_s9, 64, %s1649_s18, [#allocation5]  }
 0x2c5   :  { %s1217_s28 = smov [#allocation6]  }
 0x2c6   :  { %s901_s14 = sshll.u32 %s1217_s28, 4  ;;  %s902_s14 = int_to_ptr.vmem [resolvable:$true] %s901_s14 }
 0x2c7   :  { %s1164_s29 = scalar_lea.vmem %s902_s14, 32  ;;  %p1169_p9 = scmp.lt.s32.totalorder %s902_s14, %s902_s14 }
 0x2c8   :  { %p1165_p8 = scmp.ne.s32.totalorder %s902_s14, %s1164_s29  ;;  %p1170_p10 = scmp.lt.s32.totalorder %s1164_s29, %s1164_s29 }
 0x2ca   :  { %p1171_p11 = por %p1170_p10, %p1169_p9 }
 0x2cc   :  { %p1172_p12 = pnand %p1171_p11, %p1165_p8 }
 0x2ce   :  { %1175 = shalt.err (!%p1172_p12)
}
 0x2cf   :  { %s1176_s20 = scalar_lea.hbm %s1650_s19, 32 }
 0x2d0   :  { %p1177_p13 = scmp.ne.s32.totalorder %s1650_s19, %s1176_s20  ;;  %p1180_p0 = scmp.lt.u32.totalorder %s1176_s20, %s1650_s19 }
 0x2d2   :  { %p1182_p1 = pnand %p1180_p0, %p1177_p13 }
 0x2d4   :  { %1185 = shalt.err (!%p1182_p1)
}
 0x2d5   :  { %904 = dma.vmem_to_hbm [thread:$0]  %s902_s14, 32, %s1650_s19, [#allocation5]   ;;  %v926_v37 = vld [vmem:[%s1643_s12] ss:$0 sm:$0xff] }
 0x2d6   :  { %s1218_s6 = smov [#allocation2]  }
 0x2d7   :  { %s881_s24 = sshll.u32 %s1218_s6, 4  ;;  %s882_s24 = int_to_ptr.vmem [resolvable:$true] %s881_s24 }
 0x2d8   :  { %s1186_s25 = scalar_lea.vmem %s882_s24, 32  ;;  %p1191_p3 = scmp.lt.s32.totalorder %s882_s24, %s882_s24 }
 0x2d9   :  { %p1187_p2 = scmp.ne.s32.totalorder %s882_s24, %s1186_s25  ;;  %p1192_p4 = scmp.lt.s32.totalorder %s1186_s25, %s1186_s25 }
 0x2db   :  { %p1193_p5 = por %p1192_p4, %p1191_p3 }
 0x2dd   :  { %p1194_p6 = pnand %p1193_p5, %p1187_p2 }
 0x38f   :  { %v870_v31 = vpop.f32.mrb[10].mxu1 }
 0x390   :  { %v871_v38 = vadd.f32 %v926_v37, %v870_v31  ;;  %v1042_v39 = vpop.f32.mrb[11].mxu1 }
 0x392   :  { %874 = vst.msk [vmem:[#allocation2] sm:$0x3] %vm511_vm3, %v871_v38 }
 0x393   :  { %1197 = shalt.err (!%p1194_p6)
}
 0x394   :  { %s1198_s4 = scalar_lea.hbm %s1648_s17, 32 }
 0x395   :  { %p1199_p7 = scmp.ne.s32.totalorder %s1648_s17, %s1198_s4  ;;  %p1202_p8 = scmp.lt.u32.totalorder %s1198_s4, %s1648_s17 }
 0x397   :  { %p1204_p9 = pnand %p1202_p8, %p1199_p7 }
 0x399   :  { %1207 = shalt.err (!%p1204_p9)
}
 0x39a   :  { %884 = dma.vmem_to_hbm [thread:$0]  %s882_s24, 32, %s1648_s17, [#allocation3]  }
 0x39b   :  { %1208 = dma.done.wait [#allocation3], 32  }
 0x39c   :  { %1209 = vsyncadd [#allocation3], 4294967264 }
 0x39d   :  { %1210 = dma.done.wait [#allocation5], 96  }
 0x39e   :  { %1211 = vsyncadd [#allocation5], 4294967200 }
 0x39f   :  { %914 = vsyncpa [#allocation3], 1 }
 0x3a0   :  { %915 = vsyncpa [#allocation5], 1 }

</bundles_post_ra>
